<compile_context>
chip_gen: v7x
topology: tpu7x:2x2x1
jax: 0.10.0
libtpu: 0.0.40
codegen_flags: <defaults>
</compile_context>

<pallas_src>
import functools
import math

import jax
import jax.numpy as jnp
from jax.experimental import pallas as pl
from jax.experimental.pallas import tpu as pltpu

_LANE = 128
_MIN_SPLIT_BYTES = 1 << 20        # below ~1 MiB of input: single block
_TARGET_BLOCK_BYTES = 2 << 20     # ~2 MiB input per block ~= HBM roofline knee
_VMEM_LIMIT_CAP = 48 * 1024 * 1024  # safe even on v7x's 64 MiB per-TC VMEM


def _round_up(x, m):
    return (x + m - 1) // m * m


def _vmem_capacity_bytes():
    # With the roofline-knee block cap, capacity is only a guard rail, so a
    # conservative fallback no longer shrinks tiles on 128 MiB parts
    # (v5e/v6e) the way the old %-of-capacity budget did.
    try:
        return int(pltpu.get_tpu_info().vmem_capacity_bytes)
    except Exception:
        return 64 * 1024 * 1024


def _is_v5e():
    try:
        kind = jax.devices()[0].device_kind.lower()
    except Exception:
        return False
    return ("v5 lite" in kind) or ("v5e" in kind) or ("v5litepod" in kind)


def _pick_row_tile(n_rows, width, itemsize):
    """Pick (row_tile, vmem_limit_bytes).

    * Small inputs (<~1 MiB) run as one block: per-step overhead (~0.35 us)
      and partial pipeline fill dominate there, and single-TC v5e/v6e gain
      nothing from extra steps.
    * Otherwise target ~2 MiB of input per block (roofline knee); larger
      blocks only inflate fp32 temporaries / VMEM pressure.
    * VMEM guard: 2x double-buffered in/out tiles + ~16 B/elem fp32 temps.
    * Prefer an even number of grid steps (balances v7x's 2 TensorCores).
    """
    vmem_cap = _vmem_capacity_bytes()
    vmem_limit = int(min(vmem_cap * 3 // 4, _VMEM_LIMIT_CAP))
    row_bytes = width * itemsize
    total_bytes = n_rows * row_bytes
    if n_rows <= 8 or total_bytes <= _MIN_SPLIT_BYTES:
        return n_rows, vmem_limit

    tr = max(8, (_TARGET_BLOCK_BYTES // max(row_bytes, 1)) // 8 * 8)
    ws_per_row = width * (4 * itemsize + 16)
    tr_cap = max(8, (int(vmem_cap * 2 // 5) // max(ws_per_row, 1)) // 8 * 8)
    tr = int(min(tr, tr_cap, n_rows))

    steps = pl.cdiv(n_rows, tr)
    if steps > 1 and steps % 2 == 1:
        tr_even = max(8, _round_up(pl.cdiv(n_rows, steps + 1), 8))
        if tr_even < n_rows and pl.cdiv(n_rows, tr_even) % 2 == 0:
            tr = tr_even
    return tr, vmem_limit


def _ln_kernel(x_ref, w_ref, b_ref, o_ref, *, eps):
    """General path: one logical row per physical row (hidden = lane dim)."""
    x = x_ref[...].astype(jnp.float32)                           # (TR, H)
    mean = jnp.mean(x, axis=-1, keepdims=True)
    centered = x - mean
    var = jnp.mean(centered * centered, axis=-1, keepdims=True)  # biased, stable
    invvar = jax.lax.rsqrt(var + eps)
    w = w_ref[...].astype(jnp.float32)
    b = b_ref[...].astype(jnp.float32)
    o_ref[...] = (centered * invvar * w + b).astype(o_ref.dtype)


def _ln_packed_kernel(x_ref, w_ref, b_ref, m_ref, o_ref, *, hidden, eps):
    """Lane-packed path: G = L // hidden logical rows per L-lane physical row.

    Per-logical-row (segmented) sums run on the otherwise-idle MXU via the
    block-diagonal 0/1 matrix in m_ref, so every HBM load/store and VPU op
    is fully lane-dense (no masked vst).  0/1 products are exact and the MXU
    accumulates in fp32, so the mean matches an fp32 reduction.
    """
    inv_h = 1.0 / float(hidden)
    x_in = x_ref[...]                                            # (TR, L)
    seg = m_ref[...]                                             # (L, L)
    x = x_in.astype(jnp.float32)
    mean = jnp.dot(x_in, seg, preferred_element_type=jnp.float32) * inv_h
    centered = x - mean
    # No-op for fp32 inputs; for bf16 the variance error is <= ~2^-9 relative,
    # far below the bf16 output quantization.
    sq = (centered * centered).astype(x_in.dtype)
    var = jnp.dot(sq, seg, preferred_element_type=jnp.float32) * inv_h
    invvar = jax.lax.rsqrt(var + eps)
    w = w_ref[...].astype(jnp.float32)
    b = b_ref[...].astype(jnp.float32)
    o_ref[...] = (centered * invvar * w + b).astype(o_ref.dtype)


def mixed_fused_layer_norm(x, weight, bias, normalized_shape, eps=1e-5):
    """Forward of MixedFusedLayerNorm (affine LayerNorm, fp32 stats)."""
    if isinstance(normalized_shape, int):
        normalized_shape = (normalized_shape,)
    normalized_shape = tuple(normalized_shape)
    n_norm = len(normalized_shape)
    assert x.shape[-n_norm:] == normalized_shape

    hidden = math.prod(normalized_shape)
    rows = math.prod(x.shape[:-n_norm]) if x.shape[:-n_norm] else 1

    x2 = x.reshape(rows, hidden)
    w2 = weight.reshape(1, hidden)
    b2 = bias.reshape(1, hidden)
    itemsize = jnp.dtype(x.dtype).itemsize
    eps = float(eps)

    # Lane-dense packing: G logical rows share one L = lcm(hidden, 128) lane
    # physical row.  Only used when rows packs exactly (rows % G == 0), so no
    # wrapper-side pad / slice / concat HBM passes are ever issued, and only
    # while the segmented-sum MXU work stays hidden under HBM DMA.
    lane_group = hidden // math.gcd(hidden, _LANE) * _LANE   # lcm(hidden, 128)
    g = lane_group // hidden
    max_group = _LANE if _is_v5e() else 3 * _LANE
    use_packed = (hidden % _LANE != 0 and g > 1 and lane_group <= max_group
                  and rows >= g and rows % g == 0)

    if use_packed:
        n_prow = rows // g
        xp = x2.reshape(n_prow, lane_group)
        wp = jnp.tile(w2, (1, g))                                # (1, L)
        bp = jnp.tile(b2, (1, g))                                # (1, L)
        seg_id = jnp.arange(lane_group, dtype=jnp.int32) // hidden
        seg_mat = (seg_id[:, None] == seg_id[None, :]).astype(x.dtype)

        tr, vmem_limit = _pick_row_tile(n_prow, lane_group, itemsize)
        grid = (pl.cdiv(n_prow, tr),)
        outp = pl.pallas_call(
            functools.partial(_ln_packed_kernel, hidden=hidden, eps=eps),
            out_shape=jax.ShapeDtypeStruct((n_prow, lane_group), x.dtype),
            grid_spec=pltpu.PrefetchScalarGridSpec(
                num_scalar_prefetch=0,
                grid=grid,
                in_specs=[
                    pl.BlockSpec((tr, lane_group), lambda i: (i, 0)),
                    pl.BlockSpec((1, lane_group), lambda i: (0, 0)),
                    pl.BlockSpec((1, lane_group), lambda i: (0, 0)),
                    pl.BlockSpec((lane_group, lane_group), lambda i: (0, 0)),
                ],
                out_specs=pl.BlockSpec((tr, lane_group), lambda i: (i, 0)),
            ),
            compiler_params=pltpu.CompilerParams(
                dimension_semantics=("parallel",),
                vmem_limit_bytes=vmem_limit,
            ),
        )(xp, wp, bp, seg_mat)
        out2 = outp.reshape(rows, hidden)
    else:
        # TODO(synk): ragged row counts (rows % G != 0) and hiddens above the
        # MXU packing cap take this single-pass path with a lane-sparse output
        # when hidden % 128 != 0; a tail-split recombination would cost an
        # extra wrapper-side HBM pass, so it was deliberately not added.
        tr, vmem_limit = _pick_row_tile(rows, hidden, itemsize)
        grid = (pl.cdiv(rows, tr),)
        out2 = pl.pallas_call(
            functools.partial(_ln_kernel, eps=eps),
            out_shape=jax.ShapeDtypeStruct((rows, hidden), x.dtype),
            grid_spec=pltpu.PrefetchScalarGridSpec(
                num_scalar_prefetch=0,
                grid=grid,
                in_specs=[
                    pl.BlockSpec((tr, hidden), lambda i: (i, 0)),
                    pl.BlockSpec((1, hidden), lambda i: (0, 0)),
                    pl.BlockSpec((1, hidden), lambda i: (0, 0)),
                ],
                out_specs=pl.BlockSpec((tr, hidden), lambda i: (i, 0)),
            ),
            compiler_params=pltpu.CompilerParams(
                dimension_semantics=("parallel",),
                vmem_limit_bytes=vmem_limit,
            ),
        )(x2, w2, b2)

    return out2.reshape(x.shape)


def _reference(x, weight, bias, eps):
    xf = x.astype(jnp.float32)
    mean = jnp.mean(xf, axis=-1, keepdims=True)
    var = jnp.mean((xf - mean) ** 2, axis=-1, keepdims=True)
    return ((xf - mean) * jax.lax.rsqrt(var + eps)
            * weight.reshape(-1).astype(jnp.float32)
            + bias.reshape(-1).astype(jnp.float32)).astype(x.dtype)


def _check(x, w, b, normalized_shape, eps):
    out = jax.block_until_ready(
        mixed_fused_layer_norm(x, w, b, normalized_shape, eps))
    ref = _reference(x, w, b, eps)
    assert out.shape == x.shape and out.dtype == x.dtype
    assert jnp.allclose(out.astype(jnp.float32), ref.astype(jnp.float32),
                        atol=2e-2, rtol=2e-2)


if __name__ == "__main__":
    eps = 1e-5
    key = jax.random.PRNGKey(0)
    kx, kw, kb, kx2, kx3 = jax.random.split(key, 5)

    # Module config: normalized_shape = (32,), eps = 1e-5, bf16 params.
    batch, seq, hidden = 2, 8, 32
    normalized_shape = (hidden,)
    x = jax.random.normal(kx, (batch, seq, hidden), dtype=jnp.float32)
    x = x.astype(jnp.bfloat16)

    # reset_parameters(): ones / zeros  (exercises the lane-packed path).
    weight = jnp.ones(normalized_shape, dtype=jnp.bfloat16)
    bias = jnp.zeros(normalized_shape, dtype=jnp.bfloat16)
    _check(x, weight, bias, normalized_shape, eps)

    # Non-trivial affine params (lane-packed weight/bias tiling).
    w2 = (1.0 + 0.1 * jax.random.normal(kw, normalized_shape)).astype(jnp.bfloat16)
    b2 = (0.1 * jax.random.normal(kb, normalized_shape)).astype(jnp.bfloat16)
    _check(x, w2, b2, normalized_shape, eps)

    # Ragged row count (rows % G != 0): single-pass general path, no pad.
    x_rag = jax.random.normal(kx2, (3, 5, hidden)).astype(jnp.bfloat16)
    _check(x_rag, w2, b2, normalized_shape, eps)

    # hidden = 96: lcm(96, 128) = 384 lane group (packed on v6e/v7x,
    # general path on v5e).
    ns96 = (96,)
    x96 = jax.random.normal(kx3, (2, 8, 96)).astype(jnp.bfloat16)
    w96 = (1.0 + 0.1 * jax.random.normal(kw, ns96)).astype(jnp.bfloat16)
    b96 = (0.1 * jax.random.normal(kb, ns96)).astype(jnp.bfloat16)
    _check(x96, w96, b96, ns96, eps)

    print("KERNEL_OK")
</pallas_src>

<mosaic_0001>
module attributes {stable_mosaic.version = 11 : i64} {
  func.func @_ln_packed_kernel(%arg0: i32, %arg1: memref<4x128xbf16, #tpu.memory_space<vmem>>, %arg2: memref<1x128xbf16, #tpu.memory_space<vmem>>, %arg3: memref<1x128xbf16, #tpu.memory_space<vmem>>, %arg4: memref<128x128xbf16, #tpu.memory_space<vmem>>, %arg5: memref<4x128xbf16, #tpu.memory_space<vmem>>) attributes {dimension_semantics = [#tpu.dimension_semantics<parallel>], iteration_bounds = array<i64: 1>, scalar_prefetch = 0 : i64, scratch_operands = 0 : i64, tpu.core_type = #tpu.core_type<tc>, window_params = [{transform_indices = @transform_0, window_bounds = array<i64: 4, 128>}, {pipeline_mode = #tpu.pipeline_mode<synchronous>, transform_indices = @transform_1, window_bounds = array<i64: 1, 128>}, {pipeline_mode = #tpu.pipeline_mode<synchronous>, transform_indices = @transform_2, window_bounds = array<i64: 1, 128>}, {pipeline_mode = #tpu.pipeline_mode<synchronous>, transform_indices = @transform_3, window_bounds = array<i64: 128, 128>}, {transform_indices = @transform_4, window_bounds = array<i64: 4, 128>}]} {
    %c0 = arith.constant 0 : index
    %c0_0 = arith.constant 0 : index
    %0 = vector.load %arg1[%c0, %c0_0] : memref<4x128xbf16, #tpu.memory_space<vmem>>, vector<4x128xbf16>
    %c0_1 = arith.constant 0 : index
    %c0_2 = arith.constant 0 : index
    %1 = vector.load %arg4[%c0_1, %c0_2] : memref<128x128xbf16, #tpu.memory_space<vmem>>, vector<128x128xbf16>
    %2 = arith.extf %0 : vector<4x128xbf16> to vector<4x128xf32>
    %cst = arith.constant dense<0.000000e+00> : vector<4x128xf32>
    %3 = tpu.matmul %0, %1, %cst {dimension_numbers = #tpu.dot_dimension_numbers<[1], [0], [0], [1], [0, 0, 1, 1], [], []>} : vector<4x128xbf16>, vector<128x128xbf16>, vector<4x128xf32> -> vector<4x128xf32>
    %cst_3 = arith.constant 3.125000e-02 : f32
    %4 = vector.broadcast %cst_3 : f32 to vector<4x128xf32>
    %5 = arith.mulf %3, %4 : vector<4x128xf32>
    %6 = arith.subf %2, %5 : vector<4x128xf32>
    %7 = arith.mulf %6, %6 : vector<4x128xf32>
    %8 = arith.truncf %7 : vector<4x128xf32> to vector<4x128xbf16>
    %cst_4 = arith.constant dense<0.000000e+00> : vector<4x128xf32>
    %9 = tpu.matmul %8, %1, %cst_4 {dimension_numbers = #tpu.dot_dimension_numbers<[1], [0], [0], [1], [0, 0, 1, 1], [], []>} : vector<4x128xbf16>, vector<128x128xbf16>, vector<4x128xf32> -> vector<4x128xf32>
    %cst_5 = arith.constant 3.125000e-02 : f32
    %10 = vector.broadcast %cst_5 : f32 to vector<4x128xf32>
    %11 = arith.mulf %9, %10 : vector<4x128xf32>
    %cst_6 = arith.constant 9.99999974E-6 : f32
    %12 = vector.broadcast %cst_6 : f32 to vector<4x128xf32>
    %13 = arith.addf %11, %12 : vector<4x128xf32>
    %14 = math.rsqrt %13 : vector<4x128xf32>
    %c0_7 = arith.constant 0 : index
    %c0_8 = arith.constant 0 : index
    %15 = vector.load %arg2[%c0_7, %c0_8] : memref<1x128xbf16, #tpu.memory_space<vmem>>, vector<1x128xbf16>
    %16 = arith.extf %15 : vector<1x128xbf16> to vector<1x128xf32>
    %c0_9 = arith.constant 0 : index
    %c0_10 = arith.constant 0 : index
    %17 = vector.load %arg3[%c0_9, %c0_10] : memref<1x128xbf16, #tpu.memory_space<vmem>>, vector<1x128xbf16>
    %18 = arith.extf %17 : vector<1x128xbf16> to vector<1x128xf32>
    %19 = arith.mulf %6, %14 : vector<4x128xf32>
    %20 = vector.broadcast %16 : vector<1x128xf32> to vector<4x128xf32>
    %21 = arith.mulf %19, %20 : vector<4x128xf32>
    %22 = vector.broadcast %18 : vector<1x128xf32> to vector<4x128xf32>
    %23 = arith.addf %21, %22 : vector<4x128xf32>
    %24 = arith.truncf %23 : vector<4x128xf32> to vector<4x128xbf16>
    %c0_11 = arith.constant 0 : index
    %c0_12 = arith.constant 0 : index
    %25 = vector.load %arg5[%c0_11, %c0_12] : memref<4x128xbf16, #tpu.memory_space<vmem>>, vector<4x128xbf16>
    tpu.vector_store %arg5[%c0_11, %c0_12], %24 {strides = array<i32>} : memref<4x128xbf16, #tpu.memory_space<vmem>>, vector<4x128xbf16>,
    return
  }
  func.func @transform_0(%arg0: i32) -> (i32, i32) {
    %c0_i32 = arith.constant 0 : i32
    %c0_i32_0 = arith.constant 0 : i32
    return %arg0, %c0_i32 : i32, i32
  }
  func.func @transform_1(%arg0: i32) -> (i32, i32) {
    %c0_i32 = arith.constant 0 : i32
    %c0_i32_0 = arith.constant 0 : i32
    %c0_i32_1 = arith.constant 0 : i32
    return %c0_i32, %c0_i32_0 : i32, i32
  }
  func.func @transform_2(%arg0: i32) -> (i32, i32) {
    %c0_i32 = arith.constant 0 : i32
    %c0_i32_0 = arith.constant 0 : i32
    %c0_i32_1 = arith.constant 0 : i32
    return %c0_i32, %c0_i32_0 : i32, i32
  }
  func.func @transform_3(%arg0: i32) -> (i32, i32) {
    %c0_i32 = arith.constant 0 : i32
    %c0_i32_0 = arith.constant 0 : i32
    %c0_i32_1 = arith.constant 0 : i32
    return %c0_i32, %c0_i32_0 : i32, i32
  }
  func.func @transform_4(%arg0: i32) -> (i32, i32) {
    %c0_i32 = arith.constant 0 : i32
    %c0_i32_0 = arith.constant 0 : i32
    return %arg0, %c0_i32 : i32, i32
  }
}

</mosaic_0001>

<bundles_post_ra>
// kernel: tpu_custom_call.1
= control target key start
LH: loop header
LB: loop body
LE: loop exit
PB: predicated region body
PF: predicated region fallthrough
CT: control target
= control target key end

     0   :  { %9 = vsyncpa [#allocation3], 0  ;;  %s467_s0 = inlined_call_operand.hbm [shape: bf16[4,128], index: 0, kind: input, shape index: {}]   ;;  %s468_s1 = inlined_call_operand.vmem [shape: bf16[1,128], index: 1, kind: input, shape index: {}]   ;;  %s469_s2 = inlined_call_operand.vmem [shape: bf16[1,128], index: 2, kind: input, shape index: {}]   ;;  %s470_s3 = inlined_call_operand.hbm [shape: bf16[128,128], index: 3, kind: input, shape index: {}]   ;;  %s471_s4 = inlined_call_operand.hbm [shape: bf16[4,128], index: 4, kind: output, shape index: {}]  }
   0x1   :  { %10 = vsyncpa [#allocation6], 0 }
   0x2   :  { %11 = vsyncpa [#allocation4], 0  ;;  %s386_s15 = smov [#allocation2]   ;;  %s387_s17 = smov [#allocation5]  }
   0x3   :  { %s18_s16 = sshll.u32 %s386_s15, 4  ;;  %s31_s18 = sshll.u32 %s387_s17, 4  ;;  %s19_s16 = int_to_ptr.vmem [resolvable:$true] %s18_s16  ;;  %s418_s18 = int_to_ptr.vmem [resolvable:$true] %s31_s18 }
   0x4   :  { %s314_s21 = scalar_lea.hbm %s467_s0, 32 }
   0x5   :  { %p315_p0 = scmp.ne.s32.totalorder %s467_s0, %s314_s21  ;;  %p318_p1 = scmp.lt.u32.totalorder %s314_s21, %s467_s0 }
   0x7   :  { %p320_p2 = pnand %p318_p1, %p315_p0 }
   0x9   :  { %323 = shalt.err (!%p320_p2)
}
   0xa   :  { %s324_s26 = scalar_lea.vmem %s19_s16, 32  ;;  %p329_p4 = scmp.lt.s32.totalorder %s19_s16, %s19_s16 }
   0xb   :  { %p325_p3 = scmp.ne.s32.totalorder %s19_s16, %s324_s26  ;;  %p330_p5 = scmp.lt.s32.totalorder %s324_s26, %s324_s26 }
   0xd   :  { %p331_p6 = por %p330_p5, %p329_p4 }
   0xf   :  { %p332_p7 = pnand %p331_p6, %p325_p3 }
  0x11   :  { %335 = shalt.err (!%p332_p7)
}
  0x12   :  { %21 = dma.hbm_to_vmem [thread:$0]  %s467_s0, 32, %s19_s16, [#allocation3]  }
  0x13   :  { %s336_s5 = scalar_lea.hbm %s470_s3, 1024 }
  0x14   :  { %p337_p8 = scmp.ne.s32.totalorder %s470_s3, %s336_s5  ;;  %p340_p9 = scmp.lt.u32.totalorder %s336_s5, %s470_s3 }
  0x16   :  { %p342_p10 = pnand %p340_p9, %p337_p8 }
  0x18   :  { %345 = shalt.err (!%p342_p10)
}
  0x19   :  { %s346_s10 = scalar_lea.vmem %s418_s18, 1024  ;;  %p351_p12 = scmp.lt.s32.totalorder %s418_s18, %s418_s18 }
  0x1a   :  { %p347_p11 = scmp.ne.s32.totalorder %s418_s18, %s346_s10  ;;  %p352_p13 = scmp.lt.s32.totalorder %s346_s10, %s346_s10 }
  0x1c   :  { %p353_p0 = por %p352_p13, %p351_p12 }
  0x1e   :  { %p354_p1 = pnand %p353_p0, %p347_p11 }
  0x20   :  { %357 = shalt.err (!%p354_p1)
}
  0x21   :  { %s388_s0 = smov 64   ;;  %s389_s11 = smov 4  }
  0x22   :  { %37 = dma.hbm_to_vmem [thread:$0]  %s470_s3, 1024, %s418_s18, [#allocation6], %s388_s0, %s388_s0, %s389_s11  }
  0x23   :  { %380 = dma.done.wait [#allocation3], 32  }
  0x24   :  { %381 = vsyncadd [#allocation3], 4294967264 }
  0x25   :  { %382 = dma.done.wait [#allocation6], 1024  }
  0x26   :  { %383 = vsyncadd [#allocation6], 4294966272  ;;  %v390_v0 = vmov 0.0   ;;  %vm391_vm0 = vmmov 0   ;;  %v304_v1 = vld [vmem:[#allocation5] sm:$0xff]   ;;  %v305_v2 = vld [vmem:[#allocation5 + $0x8] sm:$0xff]   ;;  %v203_v23 = vlaneseq }
  0x27   :  { %257 = vmatprep.subr.bf16.mxu0 %v390_v0  ;;  %273 = vmatprep.mubr.msk.bf16.mxu0 %vm391_vm0, %v390_v0  ;;  %v306_v3 = vld [vmem:[#allocation5 + $0x10] sm:$0xff]   ;;  %v307_v4 = vld [vmem:[#allocation5 + $0x18] sm:$0xff]   ;;  %v308_v5 = vld [vmem:[#allocation5 + $0x20] sm:$0xff]   ;;  %s392_s17 = smov [#allocation7]  }
  0x28   :  { %277 = vmatprep.subr.bf16.mxu1 %v390_v0  ;;  %293 = vmatprep.mubr.msk.bf16.mxu1 %vm391_vm0, %v390_v0  ;;  %v309_v6 = vld [vmem:[#allocation5 + $0x28] sm:$0xff]   ;;  %v310_v7 = vld [vmem:[#allocation5 + $0x30] sm:$0xff]   ;;  %v311_v8 = vld [vmem:[#allocation5 + $0x38] sm:$0xff]   ;;  %v204_v26 = vshrl.u32 %v203_v23, 7  ;;  %s221_s18 = sshll.u32 %s392_s17, 4  ;;  %s222_s18 = int_to_ptr.vmem [resolvable:$true] %s221_s18 }
  0x29   :  { %258 = vmatpush3.bf16.msra.mxu0 %v304_v1  ;;  %278 = vmatpush3.bf16.msra.mxu1 %v304_v1  ;;  %v45_v9 = vld [vmem:[#allocation2] sm:$0x3]  ;;  %s358_s19 = scalar_lea.vmem %s222_s18, 32  ;;  %p363_p3 = scmp.lt.s32.totalorder %s222_s18, %s222_s18 }
  0x2a   :  { %259 = vmatprep.subr.bf16.mxu0 %v390_v0  ;;  %279 = vmatprep.subr.bf16.mxu1 %v390_v0  ;;  %v62_v10 = vunpack.c.l.bf16 %v45_v9  ;;  %v198_v27 = vld [vmem:[%s468_s1] sm:$0x1]  ;;  %v205_v30 = vsub.s32 0, %v204_v26  ;;  %p359_p2 = scmp.ne.s32.totalorder %s222_s18, %s358_s19  ;;  %p364_p4 = scmp.lt.s32.totalorder %s358_s19, %s358_s19 }
  0x2b   :  { %v200_v28 = vld [vmem:[%s469_s2] sm:$0x1]  ;;  %v199_v29 = vunpack.c.l.bf16 %v198_v27 }
  0x2c   :  { %v201_v31 = vunpack.c.l.bf16 %v200_v28  ;;  %p365_p5 = por %p364_p4, %p363_p3 }
  0x2d   :  { %260 = vmatpush3.bf16.msra.mxu0 %v305_v2  ;;  %280 = vmatpush3.bf16.msra.mxu1 %v305_v2  ;;  %v206_v32 = vrot.slane %v199_v29, %v205_v30 }
  0x2e   :  { %261 = vmatprep.subr.bf16.mxu0 %v390_v0  ;;  %281 = vmatprep.subr.bf16.mxu1 %v390_v0  ;;  %v211_v35 = vrot.slane %v201_v31, %v205_v30  ;;  %p366_p6 = pnand %p365_p5, %p359_p2 }
  0x31   :  { %262 = vmatpush3.bf16.msra.mxu0 %v306_v3  ;;  %282 = vmatpush3.bf16.msra.mxu1 %v306_v3 }
  0x32   :  { %263 = vmatprep.subr.bf16.mxu0 %v390_v0  ;;  %283 = vmatprep.subr.bf16.mxu1 %v390_v0 }
  0x35   :  { %264 = vmatpush3.bf16.msra.mxu0 %v307_v4  ;;  %284 = vmatpush3.bf16.msra.mxu1 %v307_v4 }
  0x36   :  { %265 = vmatprep.subr.bf16.mxu0 %v390_v0  ;;  %285 = vmatprep.subr.bf16.mxu1 %v390_v0 }
  0x39   :  { %266 = vmatpush3.bf16.msra.mxu0 %v308_v5  ;;  %286 = vmatpush3.bf16.msra.mxu1 %v308_v5 }
  0x3a   :  { %267 = vmatprep.subr.bf16.mxu0 %v390_v0  ;;  %287 = vmatprep.subr.bf16.mxu1 %v390_v0 }
  0x3d   :  { %268 = vmatpush3.bf16.msra.mxu0 %v309_v6  ;;  %288 = vmatpush3.bf16.msra.mxu1 %v309_v6 }
  0x3e   :  { %269 = vmatprep.subr.bf16.mxu0 %v390_v0  ;;  %289 = vmatprep.subr.bf16.mxu1 %v390_v0 }
  0x41   :  { %270 = vmatpush3.bf16.msra.mxu0 %v310_v7  ;;  %290 = vmatpush3.bf16.msra.mxu1 %v310_v7 }
  0x42   :  { %271 = vmatprep.subr.bf16.mxu0 %v390_v0  ;;  %291 = vmatprep.subr.bf16.mxu1 %v390_v0 }
  0x45   :  { %272 = vmatpush3.bf16.msra.mxu0 %v311_v8  ;;  %292 = vmatpush3.bf16.msra.mxu1 %v311_v8 }
  0x48   :  { %274 = vmatmul.mubr.bf16.vlgmr.msra.gmra.mrb[0].mxu0 %v45_v9 }
 0x11b   :  { %v145_v11 = vpop.f32.mrb[0].mxu0 }
 0x11c   :  { %v151_v12 = vmul.f32 0.03125, %v145_v11  ;;  %v275_v13 = vpop.f32.mrb[1].mxu0 }
 0x11d   :  { %v148_v14 = vpop.f32.mrb[2].mxu0 }
 0x11e   :  { %v152_v15 = vsub.f32 %v62_v10, %v151_v12  ;;  %v276_v16 = vpop.f32.mrb[3].mxu0 }
 0x120   :  { %v153_v17 = vmul.f32 %v152_v15, %v152_v15 }
 0x122   :  { %v154_v18 = vpack.c.bf16 %v153_v17, %v153_v17 }
 0x124   :  { %294 = vmatmul.mubr.bf16.vlgmr.msra.gmra.mrb[0].mxu1 %v154_v18 }
 0x1f7   :  { %v189_v19 = vpop.f32.mrb[0].mxu1 }
 0x1f8   :  { %v195_v20 = vmul.f32 0.03125, %v189_v19  ;;  %v295_v21 = vpop.f32.mrb[1].mxu1 }
 0x1f9   :  { %v192_v22 = vpop.f32.mrb[2].mxu1 }
 0x1fa   :  { %v196_v24 = vadd.f32 1e-05, %v195_v20  ;;  %v296_v25 = vpop.f32.mrb[3].mxu1 }
 0x1fc   :  { %312 = vrsqrt.f32 %v196_v24 }
 0x206   :  { %v313_v33 = vpop.eup %312 }
 0x207   :  { %v202_v34 = vmul.f32 %v313_v33, %v152_v15 }
 0x209   :  { %v207_v36 = vmul.f32 %v206_v32, %v202_v34 }
 0x20b   :  { %v212_v37 = vadd.f32 %v211_v35, %v207_v36 }
 0x20d   :  { %v213_v38 = vpack.c.bf16 %v212_v37, %v212_v37 }
 0x20f   :  { %214 = vst [vmem:[#allocation7] sm:$0x3] %v213_v38 }
 0x210   :  { %369 = shalt.err (!%p366_p6)
}
 0x211   :  { %s370_s20 = scalar_lea.hbm %s471_s4, 32 }
 0x212   :  { %p371_p7 = scmp.ne.s32.totalorder %s471_s4, %s370_s20  ;;  %p374_p8 = scmp.lt.u32.totalorder %s370_s20, %s471_s4 }
 0x214   :  { %p376_p9 = pnand %p374_p8, %p371_p7 }
 0x216   :  { %379 = shalt.err (!%p376_p9)
}
 0x217   :  { %224 = dma.vmem_to_hbm [thread:$0]  %s222_s18, 32, %s471_s4, [#allocation4]  }
 0x218   :  { %384 = dma.done.wait [#allocation4], 32  }
 0x219   :  { %385 = vsyncadd [#allocation4], 4294967264 }
 0x21a   :  { %228 = vsyncpa [#allocation3], 1 }
 0x21b   :  { %229 = vsyncpa [#allocation6], 1 }
 0x21c   :  { %230 = vsyncpa [#allocation4], 1 }

</bundles_post_ra>
